<compile_context>
chip_gen: v6e
topology: v6e:2x2x1
jax: 0.10.0
libtpu: 0.0.40
codegen_flags: <defaults>
</compile_context>

<pallas_src>
import jax
import jax.numpy as jnp
from jax.experimental import pallas as pl
from jax.experimental.pallas import tpu as pltpu


def _round_up(n: int, m: int) -> int:
    return ((n + m - 1) // m) * m


# ----------------------------------------------------------------------------
# Kernel
# ----------------------------------------------------------------------------
def _qnet_kernel(x_ref, w1_ref, b1_ref, w2_ref, b2_ref, o_ref):
    # fc1: MXU matmul (bf16 operands, f32 accumulation) + f32 bias + ReLU.
    h = jnp.dot(x_ref[...], w1_ref[...], preferred_element_type=jnp.float32)
    h = jnp.maximum(h + b1_ref[...], 0.0)           # VPU, f32 (v5e-safe)
    # fc2: cast hidden back to the bf16 MXU operand dtype; f32 accumulation.
    o = jnp.dot(h.astype(w2_ref.dtype), w2_ref[...],
                preferred_element_type=jnp.float32)
    o_ref[...] = (o + b2_ref[...]).astype(o_ref.dtype)   # bf16 store


# ----------------------------------------------------------------------------
# Parameter preparation (hoisted out of the per-forward path; call once per
# optimizer update, not per forward).
# ----------------------------------------------------------------------------
def prepare_params(w1, b1, w2, b2, *, mxu_dtype=jnp.bfloat16):
    """Pad + cast parameters to kernel layout.

    w1: (I, H), b1: (H,), w2: (H, O), b2: (O,)   (weights stored as PyTorch W.T)
    """
    I, H = w1.shape
    O = w2.shape[1]
    I_pad = _round_up(I, 16)      # bf16 sublane tile
    H_pad = _round_up(H, 128)     # lane-dense hidden
    O_pad = _round_up(O, 128)     # lane-dense output (unmasked vst)

    f32 = jnp.float32
    w1_p = jnp.pad(w1.astype(f32), ((0, I_pad - I), (0, H_pad - H))).astype(mxu_dtype)
    w2_p = jnp.pad(w2.astype(f32), ((0, H_pad - H), (0, O_pad - O))).astype(mxu_dtype)
    # Biases stay f32 (tiny, and keeps the bias add un-quantized).
    b1_p = jnp.pad(b1.astype(f32), (0, H_pad - H)).reshape(1, H_pad)
    b2_p = jnp.pad(b2.astype(f32), (0, O_pad - O)).reshape(1, O_pad)

    return {
        "w1": w1_p, "b1": b1_p, "w2": w2_p, "b2": b2_p,
        "in_size": I, "out_size": O, "mxu_dtype": mxu_dtype,
    }


def _choose_batch_tiling(B: int, block_b):
    """Pick (block_b, n_tiles).  Single grid step for typical batches."""
    if block_b is not None:
        assert block_b % 16 == 0, "block_b must be a multiple of 16 (bf16 sublane tile)"
        return block_b, pl.cdiv(B, block_b)
    B_pad = _round_up(B, 16)
    if B_pad <= 512:
        return B_pad, 1                       # whole batch in one grid step
    # Large replay batches: 256-row tiles (v6e/v7x MXU M), even tile count so
    # v7x's 2 TensorCores split the parallel axis evenly.
    blk = 256
    n = pl.cdiv(B, blk)
    if n % 2:
        n += 1
    return blk, n


# ----------------------------------------------------------------------------
# Forward wrapper
# ----------------------------------------------------------------------------
def linear_qnet_forward(x, params, *, block_b=None):
    """Fused 2-layer MLP forward (same math as Linear_QNet.forward).

    x: (B, I) float32, params: output of prepare_params(). Returns (B, O) f32.
    """
    B, I = x.shape
    assert I == params["in_size"]
    O = params["out_size"]
    w1_p, b1_p, w2_p, b2_p = params["w1"], params["b1"], params["w2"], params["b2"]
    I_pad, H_pad = w1_p.shape
    O_pad = w2_p.shape[1]
    mxu_dtype = params["mxu_dtype"]

    blk, n_tiles = _choose_batch_tiling(B, block_b)
    B_pad = blk * n_tiles

    # Only per-call prep: pad batch/feature dims and cast to the MXU dtype.
    x_p = jnp.pad(x.astype(jnp.float32),
                  ((0, B_pad - B), (0, I_pad - I))).astype(mxu_dtype)

    out_pad = pl.pallas_call(
        _qnet_kernel,
        out_shape=jax.ShapeDtypeStruct((B_pad, O_pad), jnp.bfloat16),
        grid_spec=pl.GridSpec(
            grid=(n_tiles,),
            in_specs=[
                pl.BlockSpec((blk, I_pad), lambda i: (i, 0)),
                # Constant index_maps: weights/biases DMA'd once, VMEM-resident.
                pl.BlockSpec((I_pad, H_pad), lambda i: (0, 0)),
                pl.BlockSpec((1, H_pad), lambda i: (0, 0)),
                pl.BlockSpec((H_pad, O_pad), lambda i: (0, 0)),
                pl.BlockSpec((1, O_pad), lambda i: (0, 0)),
            ],
            out_specs=pl.BlockSpec((blk, O_pad), lambda i: (i, 0)),
        ),
        compiler_params=pltpu.CompilerParams(
            dimension_semantics=("parallel",)),   # v7x: shard tiles over 2 TCs
    )(x_p, w1_p, b1_p, w2_p, b2_p)

    return out_pad[:B, :O].astype(jnp.float32)


# ----------------------------------------------------------------------------
# Init + pure-JAX reference
# ----------------------------------------------------------------------------
def init_params(key, input_size, hidden_size, output_size):
    """Deterministic PyTorch-style uniform init (kaiming-uniform bounds)."""
    k1, k2, k3, k4 = jax.random.split(key, 4)
    bound1 = 1.0 / (input_size ** 0.5)
    bound2 = 1.0 / (hidden_size ** 0.5)
    w1 = jax.random.uniform(k1, (input_size, hidden_size), jnp.float32,
                            -bound1, bound1)
    b1 = jax.random.uniform(k2, (hidden_size,), jnp.float32, -bound1, bound1)
    w2 = jax.random.uniform(k3, (hidden_size, output_size), jnp.float32,
                            -bound2, bound2)
    b2 = jax.random.uniform(k4, (output_size,), jnp.float32, -bound2, bound2)
    return w1, b1, w2, b2


def _reference_forward(x, w1, b1, w2, b2, mxu_dtype=jnp.bfloat16):
    """Same math in plain JAX, modelling the kernel's bf16 operand/output casts."""
    f32 = jnp.float32
    q = lambda a: a.astype(mxu_dtype).astype(f32)
    h = jnp.maximum(q(x) @ q(w1) + b1.astype(f32), 0.0)
    out = q(h) @ q(w2) + b2.astype(f32)
    return out.astype(mxu_dtype).astype(f32)      # kernel stores bf16


if __name__ == "__main__":
    # SnakeAI canonical sizes: state=11, hidden=256, actions=3.
    batch, input_size, hidden_size, output_size = 300, 11, 256, 3

    key = jax.random.PRNGKey(0)
    kx, kp = jax.random.split(key)
    x = jax.random.normal(kx, (batch, input_size), jnp.float32)
    w1, b1, w2, b2 = init_params(kp, input_size, hidden_size, output_size)
    params = prepare_params(w1, b1, w2, b2)      # hoisted: once per param update

    # Typical batch: single grid step (304-row tile).
    out = jax.block_until_ready(linear_qnet_forward(x, params))
    ref = _reference_forward(x, w1, b1, w2, b2)
    assert out.shape == (batch, output_size)
    assert out.dtype == jnp.float32
    assert jnp.allclose(out, ref, atol=5e-2, rtol=5e-2), \
        float(jnp.max(jnp.abs(out - ref)))

    # Large replay batch: exercises the tiled path (4 x 256-row tiles, even
    # tile count for v7x's 2-TC parallel split).
    xb = jax.random.normal(jax.random.PRNGKey(1), (1000, input_size), jnp.float32)
    outb = jax.block_until_ready(linear_qnet_forward(xb, params))
    refb = _reference_forward(xb, w1, b1, w2, b2)
    assert outb.shape == (1000, output_size)
    assert jnp.allclose(outb, refb, atol=5e-2, rtol=5e-2), \
        float(jnp.max(jnp.abs(outb - refb)))

    print("KERNEL_OK")
</pallas_src>

<mosaic_0001>
module attributes {stable_mosaic.version = 11 : i64} {
  func.func @_qnet_kernel(%arg0: i32, %arg1: memref<304x16xbf16, #tpu.memory_space<vmem>>, %arg2: memref<16x256xbf16, #tpu.memory_space<vmem>>, %arg3: memref<1x256xf32, #tpu.memory_space<vmem>>, %arg4: memref<256x128xbf16, #tpu.memory_space<vmem>>, %arg5: memref<1x128xf32, #tpu.memory_space<vmem>>, %arg6: memref<304x128xbf16, #tpu.memory_space<vmem>>) attributes {dimension_semantics = [#tpu.dimension_semantics<parallel>], iteration_bounds = array<i64: 1>, scalar_prefetch = 0 : i64, scratch_operands = 0 : i64, tpu.core_type = #tpu.core_type<tc>, window_params = [{transform_indices = @transform_0, window_bounds = array<i64: 304, 16>}, {pipeline_mode = #tpu.pipeline_mode<synchronous>, transform_indices = @transform_1, window_bounds = array<i64: 16, 256>}, {pipeline_mode = #tpu.pipeline_mode<synchronous>, transform_indices = @transform_2, window_bounds = array<i64: 1, 256>}, {pipeline_mode = #tpu.pipeline_mode<synchronous>, transform_indices = @transform_3, window_bounds = array<i64: 256, 128>}, {pipeline_mode = #tpu.pipeline_mode<synchronous>, transform_indices = @transform_4, window_bounds = array<i64: 1, 128>}, {transform_indices = @transform_5, window_bounds = array<i64: 304, 128>}]} {
    %c0 = arith.constant 0 : index
    %c0_0 = arith.constant 0 : index
    %0 = vector.load %arg1[%c0, %c0_0] : memref<304x16xbf16, #tpu.memory_space<vmem>>, vector<304x16xbf16>
    %c0_1 = arith.constant 0 : index
    %c0_2 = arith.constant 0 : index
    %1 = vector.load %arg2[%c0_1, %c0_2] : memref<16x256xbf16, #tpu.memory_space<vmem>>, vector<16x256xbf16>
    %cst = arith.constant dense<0.000000e+00> : vector<304x256xf32>
    %2 = tpu.matmul %0, %1, %cst {dimension_numbers = #tpu.dot_dimension_numbers<[1], [0], [0], [1], [0, 0, 1, 1], [], []>} : vector<304x16xbf16>, vector<16x256xbf16>, vector<304x256xf32> -> vector<304x256xf32>
    %c0_3 = arith.constant 0 : index
    %c0_4 = arith.constant 0 : index
    %3 = vector.load %arg3[%c0_3, %c0_4] : memref<1x256xf32, #tpu.memory_space<vmem>>, vector<1x256xf32>
    %4 = vector.broadcast %3 : vector<1x256xf32> to vector<304x256xf32>
    %5 = arith.addf %2, %4 : vector<304x256xf32>
    %cst_5 = arith.constant 0.000000e+00 : f32
    %6 = vector.broadcast %cst_5 : f32 to vector<304x256xf32>
    %7 = arith.maximumf %5, %6 : vector<304x256xf32>
    %8 = arith.truncf %7 : vector<304x256xf32> to vector<304x256xbf16>
    %c0_6 = arith.constant 0 : index
    %c0_7 = arith.constant 0 : index
    %9 = vector.load %arg4[%c0_6, %c0_7] : memref<256x128xbf16, #tpu.memory_space<vmem>>, vector<256x128xbf16>
    %cst_8 = arith.constant dense<0.000000e+00> : vector<304x128xf32>
    %10 = tpu.matmul %8, %9, %cst_8 {dimension_numbers = #tpu.dot_dimension_numbers<[1], [0], [0], [1], [0, 0, 1, 1], [], []>} : vector<304x256xbf16>, vector<256x128xbf16>, vector<304x128xf32> -> vector<304x128xf32>
    %c0_9 = arith.constant 0 : index
    %c0_10 = arith.constant 0 : index
    %11 = vector.load %arg5[%c0_9, %c0_10] : memref<1x128xf32, #tpu.memory_space<vmem>>, vector<1x128xf32>
    %12 = vector.broadcast %11 : vector<1x128xf32> to vector<304x128xf32>
    %13 = arith.addf %10, %12 : vector<304x128xf32>
    %14 = arith.truncf %13 : vector<304x128xf32> to vector<304x128xbf16>
    %c0_11 = arith.constant 0 : index
    %c0_12 = arith.constant 0 : index
    %15 = vector.load %arg6[%c0_11, %c0_12] : memref<304x128xbf16, #tpu.memory_space<vmem>>, vector<304x128xbf16>
    tpu.vector_store %arg6[%c0_11, %c0_12], %14 {strides = array<i32>} : memref<304x128xbf16, #tpu.memory_space<vmem>>, vector<304x128xbf16>,
    return
  }
  func.func @transform_0(%arg0: i32) -> (i32, i32) {
    %c0_i32 = arith.constant 0 : i32
    %c0_i32_0 = arith.constant 0 : i32
    return %arg0, %c0_i32 : i32, i32
  }
  func.func @transform_1(%arg0: i32) -> (i32, i32) {
    %c0_i32 = arith.constant 0 : i32
    %c0_i32_0 = arith.constant 0 : i32
    %c0_i32_1 = arith.constant 0 : i32
    return %c0_i32, %c0_i32_0 : i32, i32
  }
  func.func @transform_2(%arg0: i32) -> (i32, i32) {
    %c0_i32 = arith.constant 0 : i32
    %c0_i32_0 = arith.constant 0 : i32
    %c0_i32_1 = arith.constant 0 : i32
    return %c0_i32, %c0_i32_0 : i32, i32
  }
  func.func @transform_3(%arg0: i32) -> (i32, i32) {
    %c0_i32 = arith.constant 0 : i32
    %c0_i32_0 = arith.constant 0 : i32
    %c0_i32_1 = arith.constant 0 : i32
    return %c0_i32, %c0_i32_0 : i32, i32
  }
  func.func @transform_4(%arg0: i32) -> (i32, i32) {
    %c0_i32 = arith.constant 0 : i32
    %c0_i32_0 = arith.constant 0 : i32
    %c0_i32_1 = arith.constant 0 : i32
    return %c0_i32, %c0_i32_0 : i32, i32
  }
  func.func @transform_5(%arg0: i32) -> (i32, i32) {
    %c0_i32 = arith.constant 0 : i32
    %c0_i32_0 = arith.constant 0 : i32
    return %arg0, %c0_i32 : i32, i32
  }
}

</mosaic_0001>

<bundles_post_ra>
// kernel: tpu_custom_call.1
= control target key start
LH: loop header
LB: loop body
LE: loop exit
PB: predicated region body
PF: predicated region fallthrough
CT: control target
= control target key end

     0   :  { %v1442_v2 = vmov 0   ;;  %vm179_vm0 = vcmask 130048   ;;  %s1786_s0 = inlined_call_operand.vmem [shape: bf16[304,16], index: 0, kind: input, shape index: {}]   ;;  %s1787_s1 = inlined_call_operand.vmem [shape: bf16[16,256], index: 1, kind: input, shape index: {}]   ;;  %s1788_s2 = inlined_call_operand.vmem [shape: f32[1,256], index: 2, kind: input, shape index: {}]   ;;  %s1789_s3 = inlined_call_operand.vmem [shape: bf16[256,128], index: 3, kind: input, shape index: {}]   ;;  %s1790_s4 = inlined_call_operand.vmem [shape: f32[1,128], index: 4, kind: input, shape index: {}]   ;;  %s1791_s5 = inlined_call_operand.hbm [shape: bf16[304,128], index: 5, kind: output, shape index: {}]  }
   0x1   :  { %v1382_v0 = vld [vmem:[%s1787_s1 + $0x4] ss:$8 sps:$4 sm:$0xff]   ;;  %v1384_v1 = vld [vmem:[%s1787_s1] ss:$8 sps:$4 sm:$0xff]   ;;  %269 = vmatprep.mubr.bf16.mxu0 %v1442_v2  ;;  %1346 = vmatprep.subr.bf16.mxu1 %v1442_v2  ;;  %v1387_v5 = vld [vmem:[%s1786_s0 + $0x10] sm:$0xff]  }
   0x2   :  { %251 = vmatprep.subr.bf16.mxu0 %v1382_v0  ;;  %v1385_v3 = vld [vmem:[%s1786_s0] sm:$0xff]   ;;  %v1386_v4 = vld [vmem:[%s1786_s0 + $0x8] sm:$0xff]   ;;  %v1403_v6 = vld [vmem:[%s1789_s3 + $0x38] sm:$0xff]  }
   0x3   :  { %252 = vmatpush1.bf16.msra.mxu0 %v1384_v1  ;;  %1362 = vmatpush1.bf16.msra.mxu1 %v1403_v6  ;;  %v1405_v7 = vld [vmem:[%s1789_s3 + $0x30] sm:$0xff]   ;;  %v1388_v8 = vld [vmem:[%s1786_s0 + $0x18] sm:$0xff]   ;;  %v1406_v9 = vld [vmem:[%s1789_s3 + $0x28] sm:$0xff]  }
   0x4   :  { %709 = vmatprep.subr.bf16.mxu0 %v1442_v2  ;;  %1347 = vmatprep.subr.bf16.mxu1 %v1442_v2  ;;  %v1407_v10 = vld [vmem:[%s1789_s3 + $0x20] sm:$0xff]   ;;  %v1408_v12 = vld [vmem:[%s1789_s3 + $0x18] sm:$0xff]  }
   0x5   :  { %v1389_v11 = vld [vmem:[%s1786_s0 + $0x20] sm:$0xff]  }
   0x6   :  { %1121 = vmatmul.mubr.msk.bf16.vlgmr.msra.gmra.mxu0 %vm179_vm0, %v1385_v3 }
   0x7   :  { %279 = vmatprep.mubr.bf16.mxu0 %v1442_v2  ;;  %710 = vmatpush1.bf16.msra.mxu0 %v1403_v6 }
   0x8   :  { %711 = vmatprep.subr.bf16.mxu0 %v1442_v2  ;;  %1363 = vmatpush1.bf16.msra.mxu1 %v1405_v7 }
   0x9   :  { %1348 = vmatprep.subr.bf16.mxu1 %v1442_v2 }
   0xb   :  { %712 = vmatpush1.bf16.msra.mxu0 %v1405_v7 }
   0xc   :  { %713 = vmatprep.subr.bf16.mxu0 %v1442_v2  ;;  %1364 = vmatpush1.bf16.msra.mxu1 %v1406_v9 }
   0xd   :  { %1349 = vmatprep.subr.bf16.mxu1 %v1442_v2 }
   0xe   :  { %1122 = vmatmul.mubr.msk.bf16.gmra.mxu0 %vm179_vm0, %v1386_v4 }
   0xf   :  { %289 = vmatprep.mubr.bf16.mxu0 %v1442_v2  ;;  %714 = vmatpush1.bf16.msra.mxu0 %v1406_v9 }
  0x10   :  { %715 = vmatprep.subr.bf16.mxu0 %v1442_v2  ;;  %1365 = vmatpush1.bf16.msra.mxu1 %v1407_v10 }
  0x11   :  { %1350 = vmatprep.subr.bf16.mxu1 %v1442_v2 }
  0x13   :  { %716 = vmatpush1.bf16.msra.mxu0 %v1407_v10 }
  0x16   :  { %1123 = vmatmul.mubr.msk.bf16.gmra.mxu0 %vm179_vm0, %v1387_v5 }
  0x17   :  { %299 = vmatprep.mubr.bf16.mxu0 %v1442_v2 }
  0x1e   :  { %1124 = vmatmul.mubr.msk.bf16.gmra.mxu0 %vm179_vm0, %v1388_v8 }
  0x1f   :  { %309 = vmatprep.mubr.bf16.mxu0 %v1442_v2 }
  0x20   :  { %10 = vsyncpa [#allocation3], 0  ;;  %717 = vmatprep.subr.bf16.mxu0 %v1442_v2  ;;  %1366 = vmatpush1.bf16.msra.mxu1 %v1408_v12  ;;  %v1409_v13 = vld [vmem:[%s1789_s3 + $0x10] sm:$0xff]   ;;  %v1390_v14 = vld [vmem:[%s1786_s0 + $0x28] sm:$0xff]   ;;  %v64_v38 = vlaneseq }
  0x21   :  { %718 = vmatpush1.bf16.msra.mxu0 %v1408_v12  ;;  %1351 = vmatprep.subr.bf16.mxu1 %v1442_v2  ;;  %v1410_v15 = vld [vmem:[%s1789_s3 + $0x8] sm:$0xff]   ;;  %v1411_v16 = vld [vmem:[%s1789_s3] sm:$0xff]   ;;  %v1391_v17 = vld [vmem:[%s1786_s0 + $0x30] sm:$0xff]  }
  0x22   :  { %719 = vmatprep.subr.bf16.mxu0 %v1442_v2  ;;  %v1412_v18 = vld [vmem:[%s1789_s3 + $0x78] sm:$0xff]   ;;  %v1413_v19 = vld [vmem:[%s1789_s3 + $0x70] sm:$0xff]   ;;  %v1414_v21 = vld [vmem:[%s1789_s3 + $0x68] sm:$0xff]   ;;  %v65_v39 = vshrl.u32 %v64_v38, 7 }
  0x23   :  { %v1392_v20 = vld [vmem:[%s1786_s0 + $0x38] sm:$0xff]   ;;  %v1415_v22 = vld [vmem:[%s1789_s3 + $0x60] sm:$0xff]   ;;  %v1417_v25 = vld [vmem:[%s1789_s3 + $0x50] sm:$0xff]  }
  0x24   :  { %1367 = vmatpush1.bf16.msra.mxu1 %v1409_v13  ;;  %v1393_v23 = vld [vmem:[%s1786_s0 + $0x40] sm:$0xff]   ;;  %v1416_v24 = vld [vmem:[%s1789_s3 + $0x58] sm:$0xff]   ;;  %v1394_v26 = vld [vmem:[%s1786_s0 + $0x48] sm:$0xff]   ;;  %v70_v40 = vsub.s32 1, %v65_v39  ;;  %v66_v41 = vsub.s32 0, %v65_v39 }
  0x25   :  { %720 = vmatpush1.bf16.msra.mxu0 %v1409_v13  ;;  %1352 = vmatprep.subr.bf16.mxu1 %v1442_v2  ;;  %v1418_v27 = vld [vmem:[%s1789_s3 + $0x48] sm:$0xff]   ;;  %v1419_v28 = vld [vmem:[%s1789_s3 + $0x40] sm:$0xff]   ;;  %v1395_v29 = vld [vmem:[%s1786_s0 + $0x50] sm:$0xff]  }
  0x26   :  { %1125 = vmatmul.mubr.msk.bf16.gmra.mxu0 %vm179_vm0, %v1389_v11  ;;  %721 = vmatprep.subr.bf16.mxu0 %v1442_v2  ;;  %v1396_v30 = vld [vmem:[%s1786_s0 + $0x58] sm:$0xff]   ;;  %v1397_v31 = vld [vmem:[%s1786_s0 + $0x60] sm:$0xff]   ;;  %v1398_v32 = vld [vmem:[%s1786_s0 + $0x68] sm:$0xff]  }
  0x27   :  { %319 = vmatprep.mubr.bf16.mxu0 %v1442_v2  ;;  %v1399_v33 = vld [vmem:[%s1786_s0 + $0x70] sm:$0xff]   ;;  %v1400_v34 = vld [vmem:[%s1786_s0 + $0x78] sm:$0xff]   ;;  %v1401_v35 = vld [vmem:[%s1786_s0 + $0x80] sm:$0xff]  }
  0x28   :  { %1368 = vmatpush1.bf16.msra.mxu1 %v1410_v15  ;;  %v1402_v36 = vld [vmem:[%s1786_s0 + $0x88] sm:$0xff]   ;;  %v1404_v37 = vld [vmem:[%s1786_s0 + $0x90] sm:$0xff]   ;;  %v62_v42 = vld [vmem:[%s1788_s2] sm:$0x3] }
  0x29   :  { %722 = vmatpush1.bf16.msra.mxu0 %v1410_v15  ;;  %1353 = vmatprep.subr.bf16.mxu1 %v1442_v2  ;;  %v1660_v44 = vrot.slane %v62_v42, %v70_v40  ;;  %v1662_v45 = vrot.slane %v62_v42, %v66_v41 }
  0x2a   :  { %723 = vmatprep.subr.bf16.mxu0 %v1442_v2 }
  0x2c   :  { %1369 = vmatpush1.bf16.msra.mxu1 %v1411_v16 }
  0x2d   :  { %724 = vmatpush1.bf16.msra.mxu0 %v1411_v16  ;;  %1354 = vmatprep.subr.bf16.mxu1 %v1442_v2 }
  0x2e   :  { %1126 = vmatmul.mubr.msk.bf16.gmra.mxu0 %vm179_vm0, %v1390_v14  ;;  %725 = vmatprep.subr.bf16.mxu0 %v1442_v2 }
  0x2f   :  { %329 = vmatprep.mubr.bf16.mxu0 %v1442_v2 }
  0x30   :  { %1370 = vmatpush2.bf16.msra.mxu1 %v1412_v18 }
  0x31   :  { %726 = vmatpush2.bf16.msra.mxu0 %v1412_v18  ;;  %1355 = vmatprep.subr.bf16.mxu1 %v1442_v2 }
  0x32   :  { %727 = vmatprep.subr.bf16.mxu0 %v1442_v2 }
  0x34   :  { %1371 = vmatpush2.bf16.msra.mxu1 %v1413_v19 }
  0x35   :  { %728 = vmatpush2.bf16.msra.mxu0 %v1413_v19  ;;  %1356 = vmatprep.subr.bf16.mxu1 %v1442_v2 }
  0x36   :  { %1127 = vmatmul.mubr.msk.bf16.gmra.mxu0 %vm179_vm0, %v1391_v17  ;;  %729 = vmatprep.subr.bf16.mxu0 %v1442_v2 }
  0x37   :  { %339 = vmatprep.mubr.bf16.mxu0 %v1442_v2 }
  0x38   :  { %1372 = vmatpush2.bf16.msra.mxu1 %v1414_v21 }
  0x39   :  { %730 = vmatpush2.bf16.msra.mxu0 %v1414_v21  ;;  %1357 = vmatprep.subr.bf16.mxu1 %v1442_v2 }
  0x3a   :  { %731 = vmatprep.subr.bf16.mxu0 %v1442_v2 }
  0x3c   :  { %1373 = vmatpush2.bf16.msra.mxu1 %v1415_v22 }
  0x3d   :  { %732 = vmatpush2.bf16.msra.mxu0 %v1415_v22  ;;  %1358 = vmatprep.subr.bf16.mxu1 %v1442_v2 }
  0x3e   :  { %1128 = vmatmul.mubr.msk.bf16.gmra.mxu0 %vm179_vm0, %v1392_v20  ;;  %733 = vmatprep.subr.bf16.mxu0 %v1442_v2 }
  0x3f   :  { %349 = vmatprep.mubr.bf16.mxu0 %v1442_v2 }
  0x40   :  { %1374 = vmatpush2.bf16.msra.mxu1 %v1416_v24 }
  0x41   :  { %734 = vmatpush2.bf16.msra.mxu0 %v1416_v24  ;;  %1359 = vmatprep.subr.bf16.mxu1 %v1442_v2 }
  0x42   :  { %735 = vmatprep.subr.bf16.mxu0 %v1442_v2 }
  0x44   :  { %1375 = vmatpush2.bf16.msra.mxu1 %v1417_v25 }
  0x45   :  { %736 = vmatpush2.bf16.msra.mxu0 %v1417_v25  ;;  %1360 = vmatprep.subr.bf16.mxu1 %v1442_v2 }
  0x46   :  { %1129 = vmatmul.mubr.msk.bf16.gmra.mxu0 %vm179_vm0, %v1393_v23  ;;  %737 = vmatprep.subr.bf16.mxu0 %v1442_v2 }
  0x47   :  { %359 = vmatprep.mubr.bf16.mxu0 %v1442_v2 }
  0x48   :  { %1376 = vmatpush2.bf16.msra.mxu1 %v1418_v27 }
  0x49   :  { %738 = vmatpush2.bf16.msra.mxu0 %v1418_v27  ;;  %1361 = vmatprep.subr.bf16.mxu1 %v1442_v2 }
  0x4a   :  { %739 = vmatprep.subr.bf16.mxu0 %v1442_v2 }
  0x4c   :  { %1377 = vmatpush2.bf16.msra.mxu1 %v1419_v28 }
  0x4d   :  { %740 = vmatpush2.bf16.msra.mxu0 %v1419_v28 }
  0x4e   :  { %1130 = vmatmul.mubr.msk.bf16.gmra.mxu0 %vm179_vm0, %v1394_v26 }
  0x4f   :  { %369 = vmatprep.mubr.bf16.mxu0 %v1442_v2 }
  0x56   :  { %1131 = vmatmul.mubr.msk.bf16.gmra.mxu0 %vm179_vm0, %v1395_v29 }
  0x57   :  { %379 = vmatprep.mubr.bf16.mxu0 %v1442_v2 }
  0x5e   :  { %1132 = vmatmul.mubr.msk.bf16.gmra.mxu0 %vm179_vm0, %v1396_v30 }
  0x5f   :  { %389 = vmatprep.mubr.bf16.mxu0 %v1442_v2 }
  0x66   :  { %1133 = vmatmul.mubr.msk.bf16.gmra.mxu0 %vm179_vm0, %v1397_v31 }
  0x67   :  { %399 = vmatprep.mubr.bf16.mxu0 %v1442_v2 }
  0x6e   :  { %1134 = vmatmul.mubr.msk.bf16.gmra.mxu0 %vm179_vm0, %v1398_v32 }
  0x6f   :  { %409 = vmatprep.mubr.bf16.mxu0 %v1442_v2 }
  0x76   :  { %1135 = vmatmul.mubr.msk.bf16.gmra.mxu0 %vm179_vm0, %v1399_v33 }
  0x77   :  { %419 = vmatprep.mubr.bf16.mxu0 %v1442_v2 }
  0x7e   :  { %1136 = vmatmul.mubr.msk.bf16.gmra.mxu0 %vm179_vm0, %v1400_v34 }
  0x7f   :  { %429 = vmatprep.mubr.bf16.mxu0 %v1442_v2 }
  0x86   :  { %1137 = vmatmul.mubr.msk.bf16.gmra.mxu0 %vm179_vm0, %v1401_v35 }
  0x87   :  { %439 = vmatprep.mubr.bf16.mxu0 %v1442_v2 }
  0x8e   :  { %1138 = vmatmul.mubr.msk.bf16.gmra.mxu0 %vm179_vm0, %v1402_v36 }
  0x8f   :  { %449 = vmatprep.mubr.bf16.mxu0 %v1442_v2 }
  0x96   :  { %1139 = vmatmul.mubr.msk.bf16.gmra.mxu0 %vm179_vm0, %v1404_v37 }
  0xc6   :  { %v271_v43 = vpop.f32.mrf.mxu0 }
  0xc7   :  { %v272_v50 = vadd.f32 %v271_v43, %v1662_v45 }
  0xc8   :  { %v273_v46 = vpop.f32.mrf.mxu0 }
  0xc9   :  { %v274_v48 = vadd.f32 %v273_v46, %v1660_v44  ;;  %v460_v57 = vmax.f32 %v272_v50, 0.0 }
  0xca   :  { %v275_v47 = vpop.f32.mrf.mxu0 }
  0xcb   :  { %v276_v49 = vadd.f32 %v275_v47, %v1662_v45  ;;  %v461_v55 = vmax.f32 %v274_v48, 0.0 }
  0xcc   :  { %v277_v51 = vpop.f32.mrf.mxu0 }
  0xcd   :  { %v278_v52 = vadd.f32 %v277_v51, %v1660_v44  ;;  %v462_v53 = vmax.f32 %v276_v49, 0.0 }
  0xce   :  { %v281_v54 = vpop.f32.mrf.mxu0 }
  0xcf   :  { %v463_v56 = vmax.f32 %v278_v52, 0.0  ;;  %v536_v60 = vpack.c.bf16 %v462_v53, %v460_v57  ;;  %v282_v0 = vadd.f32 %v281_v54, %v1662_v45 }
  0xd0   :  { %v283_v58 = vpop.f32.mrf.mxu0 }
  0xd1   :  { %v537_v59 = vpack.c.bf16 %v463_v56, %v461_v55  ;;  %v284_v62 = vadd.f32 %v283_v58, %v1660_v44  ;;  %v464_v7 = vmax.f32 %v282_v0, 0.0 }
  0xd2   :  { %v285_v61 = vpop.f32.mrf.mxu0 }
  0xd3   :  { %v286_v63 = vadd.f32 %v285_v61, %v1662_v45  ;;  %741 = vmatprep.mubr.bf16.mxu0 %v537_v59  ;;  %v465_v5 = vmax.f32 %v284_v62, 0.0 }
  0xd4   :  { %v287_v1 = vpop.f32.mrf.mxu0  ;;  %742 = vmatmul.mubr.bf16.vlgmr.msra.gmra.mxu0 %v536_v60 }
  0xd5   :  { %v288_v2 = vadd.f32 %v287_v1, %v1660_v44  ;;  %v466_v3 = vmax.f32 %v286_v63, 0.0 }
  0xd6   :  { %v291_v4 = vpop.f32.mrf.mxu0 }
  0xd7   :  { %v467_v6 = vmax.f32 %v288_v2, 0.0  ;;  %v538_v10 = vpack.c.bf16 %v466_v3, %v464_v7  ;;  %v292_v14 = vadd.f32 %v291_v4, %v1662_v45 }
  0xd8   :  { %v293_v8 = vpop.f32.mrf.mxu0 }
  0xd9   :  { %v539_v9 = vpack.c.bf16 %v467_v6, %v465_v5  ;;  %v294_v12 = vadd.f32 %v293_v8, %v1660_v44  ;;  %v468_v21 = vmax.f32 %v292_v14, 0.0 }
  0xda   :  { %v295_v11 = vpop.f32.mrf.mxu0 }
  0xdb   :  { %v296_v13 = vadd.f32 %v295_v11, %v1662_v45  ;;  %749 = vmatprep.mubr.bf16.mxu0 %v539_v9  ;;  %v469_v19 = vmax.f32 %v294_v12, 0.0 }
  0xdc   :  { %v297_v15 = vpop.f32.mrf.mxu0  ;;  %750 = vmatmul.mubr.bf16.gmra.mxu0 %v538_v10 }
  0xdd   :  { %v298_v16 = vadd.f32 %v297_v15, %v1660_v44  ;;  %v470_v17 = vmax.f32 %v296_v13, 0.0 }
  0xde   :  { %v301_v18 = vpop.f32.mrf.mxu0 }
  0xdf   :  { %v471_v20 = vmax.f32 %v298_v16, 0.0  ;;  %v540_v24 = vpack.c.bf16 %v470_v17, %v468_v21  ;;  %v302_v28 = vadd.f32 %v301_v18, %v1662_v45 }
  0xe0   :  { %v303_v22 = vpop.f32.mrf.mxu0 }
  0xe1   :  { %v541_v23 = vpack.c.bf16 %v471_v20, %v469_v19  ;;  %v304_v26 = vadd.f32 %v303_v22, %v1660_v44  ;;  %v472_v35 = vmax.f32 %v302_v28, 0.0 }
  0xe2   :  { %v305_v25 = vpop.f32.mrf.mxu0 }
  0xe3   :  { %v306_v27 = vadd.f32 %v305_v25, %v1662_v45  ;;  %757 = vmatprep.mubr.bf16.mxu0 %v541_v23  ;;  %v473_v33 = vmax.f32 %v304_v26, 0.0 }
  0xe4   :  { %v307_v29 = vpop.f32.mrf.mxu0  ;;  %758 = vmatmul.mubr.bf16.gmra.mxu0 %v540_v24 }
  0xe5   :  { %v308_v30 = vadd.f32 %v307_v29, %v1660_v44  ;;  %v474_v31 = vmax.f32 %v306_v27, 0.0 }
  0xe6   :  { %v311_v32 = vpop.f32.mrf.mxu0 }
  0xe7   :  { %v475_v34 = vmax.f32 %v308_v30, 0.0  ;;  %v542_v38 = vpack.c.bf16 %v474_v31, %v472_v35  ;;  %v312_v42 = vadd.f32 %v311_v32, %v1662_v45 }
  0xe8   :  { %v313_v36 = vpop.f32.mrf.mxu0 }
  0xe9   :  { %v543_v37 = vpack.c.bf16 %v475_v34, %v473_v33  ;;  %v314_v40 = vadd.f32 %v313_v36, %v1660_v44  ;;  %v476_v51 = vmax.f32 %v312_v42, 0.0 }
  0xea   :  { %v315_v39 = vpop.f32.mrf.mxu0 }
  0xeb   :  { %v316_v41 = vadd.f32 %v315_v39, %v1662_v45  ;;  %765 = vmatprep.mubr.bf16.mxu1 %v543_v37  ;;  %v477_v49 = vmax.f32 %v314_v40, 0.0 }
  0xec   :  { %v317_v43 = vpop.f32.mrf.mxu0  ;;  %766 = vmatmul.mubr.bf16.vlgmr.msra.gmra.mxu1 %v542_v38 }
  0xed   :  { %v318_v46 = vadd.f32 %v317_v43, %v1660_v44  ;;  %v478_v47 = vmax.f32 %v316_v41, 0.0 }
  0xee   :  { %v321_v48 = vpop.f32.mrf.mxu0 }
  0xef   :  { %v479_v50 = vmax.f32 %v318_v46, 0.0  ;;  %v544_v54 = vpack.c.bf16 %v478_v47, %v476_v51  ;;  %v322_v58 = vadd.f32 %v321_v48, %v1662_v45 }
  0xf0   :  { %v323_v52 = vpop.f32.mrf.mxu0 }
  0xf1   :  { %v545_v53 = vpack.c.bf16 %v479_v50, %v477_v49  ;;  %v324_v56 = vadd.f32 %v323_v52, %v1660_v44  ;;  %v480_v1 = vmax.f32 %v322_v58, 0.0 }
  0xf2   :  { %v325_v55 = vpop.f32.mrf.mxu0 }
  0xf3   :  { %v326_v57 = vadd.f32 %v325_v55, %v1662_v45  ;;  %773 = vmatprep.mubr.bf16.mxu1 %v545_v53  ;;  %v481_v63 = vmax.f32 %v324_v56, 0.0 }
  0xf4   :  { %v327_v59 = vpop.f32.mrf.mxu0  ;;  %774 = vmatmul.mubr.bf16.gmra.mxu1 %v544_v54 }
  0xf5   :  { %v328_v60 = vadd.f32 %v327_v59, %v1660_v44  ;;  %v482_v61 = vmax.f32 %v326_v57, 0.0 }
  0xf6   :  { %v331_v62 = vpop.f32.mrf.mxu0 }
  0xf7   :  { %v483_v0 = vmax.f32 %v328_v60, 0.0  ;;  %v546_v4 = vpack.c.bf16 %v482_v61, %v480_v1  ;;  %v332_v8 = vadd.f32 %v331_v62, %v1662_v45 }
  0xf8   :  { %v333_v2 = vpop.f32.mrf.mxu0 }
  0xf9   :  { %v547_v3 = vpack.c.bf16 %v483_v0, %v481_v63  ;;  %v334_v6 = vadd.f32 %v333_v2, %v1660_v44  ;;  %v484_v15 = vmax.f32 %v332_v8, 0.0 }
  0xfa   :  { %v335_v5 = vpop.f32.mrf.mxu0 }
  0xfb   :  { %v336_v7 = vadd.f32 %v335_v5, %v1662_v45  ;;  %781 = vmatprep.mubr.bf16.mxu1 %v547_v3  ;;  %v485_v13 = vmax.f32 %v334_v6, 0.0 }
  0xfc   :  { %v337_v9 = vpop.f32.mrf.mxu0  ;;  %782 = vmatmul.mubr.bf16.gmra.mxu1 %v546_v4 }
  0xfd   :  { %v338_v10 = vadd.f32 %v337_v9, %v1660_v44  ;;  %v486_v11 = vmax.f32 %v336_v7, 0.0 }
  0xfe   :  { %v341_v12 = vpop.f32.mrf.mxu0 }
  0xff   :  { %v487_v14 = vmax.f32 %v338_v10, 0.0  ;;  %v548_v18 = vpack.c.bf16 %v486_v11, %v484_v15  ;;  %v342_v22 = vadd.f32 %v341_v12, %v1662_v45 }
 0x100   :  { %v343_v16 = vpop.f32.mrf.mxu0 }
 0x101   :  { %v549_v17 = vpack.c.bf16 %v487_v14, %v485_v13  ;;  %v344_v20 = vadd.f32 %v343_v16, %v1660_v44  ;;  %v488_v29 = vmax.f32 %v342_v22, 0.0 }
 0x102   :  { %v345_v19 = vpop.f32.mrf.mxu0 }
 0x103   :  { %v346_v21 = vadd.f32 %v345_v19, %v1662_v45  ;;  %789 = vmatprep.mubr.bf16.mxu1 %v549_v17  ;;  %v489_v27 = vmax.f32 %v344_v20, 0.0 }
 0x104   :  { %v347_v23 = vpop.f32.mrf.mxu0  ;;  %790 = vmatmul.mubr.bf16.gmra.mxu1 %v548_v18 }
 0x105   :  { %v348_v24 = vadd.f32 %v347_v23, %v1660_v44  ;;  %v490_v25 = vmax.f32 %v346_v21, 0.0 }
 0x106   :  { %v351_v26 = vpop.f32.mrf.mxu0 }
 0x107   :  { %v491_v28 = vmax.f32 %v348_v24, 0.0  ;;  %v550_v32 = vpack.c.bf16 %v490_v25, %v488_v29  ;;  %v352_v36 = vadd.f32 %v351_v26, %v1662_v45 }
 0x108   :  { %v353_v30 = vpop.f32.mrf.mxu0 }
 0x109   :  { %v551_v31 = vpack.c.bf16 %v491_v28, %v489_v27  ;;  %v354_v34 = vadd.f32 %v353_v30, %v1660_v44  ;;  %v492_v43 = vmax.f32 %v352_v36, 0.0 }
 0x10a   :  { %v355_v33 = vpop.f32.mrf.mxu0 }
 0x10b   :  { %v356_v35 = vadd.f32 %v355_v33, %v1662_v45  ;;  %797 = vmatprep.mubr.bf16.mxu1 %v551_v31  ;;  %v493_v41 = vmax.f32 %v354_v34, 0.0 }
 0x10c   :  { %v357_v37 = vpop.f32.mrf.mxu0  ;;  %798 = vmatmul.mubr.bf16.gmra.mxu1 %v550_v32 }
 0x10d   :  { %v358_v38 = vadd.f32 %v357_v37, %v1660_v44  ;;  %v494_v39 = vmax.f32 %v356_v35, 0.0 }
 0x10e   :  { %v361_v40 = vpop.f32.mrf.mxu0 }
 0x10f   :  { %v495_v42 = vmax.f32 %v358_v38, 0.0  ;;  %v552_v48 = vpack.c.bf16 %v494_v39, %v492_v43  ;;  %v362_v52 = vadd.f32 %v361_v40, %v1662_v45 }
 0x110   :  { %v363_v46 = vpop.f32.mrf.mxu0 }
 0x111   :  { %v553_v47 = vpack.c.bf16 %v495_v42, %v493_v41  ;;  %v364_v50 = vadd.f32 %v363_v46, %v1660_v44  ;;  %v496_v59 = vmax.f32 %v362_v52, 0.0 }
 0x112   :  { %v365_v49 = vpop.f32.mrf.mxu0 }
 0x113   :  { %v366_v51 = vadd.f32 %v365_v49, %v1662_v45  ;;  %805 = vmatprep.mubr.bf16.mxu1 %v553_v47  ;;  %v497_v57 = vmax.f32 %v364_v50, 0.0 }
 0x114   :  { %v367_v53 = vpop.f32.mrf.mxu0  ;;  %806 = vmatmul.mubr.bf16.gmra.mxu1 %v552_v48 }
 0x115   :  { %v368_v54 = vadd.f32 %v367_v53, %v1660_v44  ;;  %v498_v55 = vmax.f32 %v366_v51, 0.0 }
 0x116   :  { %v371_v56 = vpop.f32.mrf.mxu0 }
 0x117   :  { %v499_v58 = vmax.f32 %v368_v54, 0.0  ;;  %v554_v62 = vpack.c.bf16 %v498_v55, %v496_v59  ;;  %v372_v2 = vadd.f32 %v371_v56, %v1662_v45 }
 0x118   :  { %v373_v60 = vpop.f32.mrf.mxu0 }
 0x119   :  { %v555_v61 = vpack.c.bf16 %v499_v58, %v497_v57  ;;  %v374_v0 = vadd.f32 %v373_v60, %v1660_v44  ;;  %v500_v9 = vmax.f32 %v372_v2, 0.0 }
 0x11a   :  { %v375_v63 = vpop.f32.mrf.mxu0 }
 0x11b   :  { %v376_v1 = vadd.f32 %v375_v63, %v1662_v45  ;;  %813 = vmatprep.mubr.bf16.mxu1 %v555_v61  ;;  %v501_v7 = vmax.f32 %v374_v0, 0.0 }
 0x11c   :  { %v377_v3 = vpop.f32.mrf.mxu0  ;;  %814 = vmatmul.mubr.bf16.gmra.mxu1 %v554_v62 }
 0x11d   :  { %v378_v4 = vadd.f32 %v377_v3, %v1660_v44  ;;  %v502_v5 = vmax.f32 %v376_v1, 0.0 }
 0x11e   :  { %v381_v6 = vpop.f32.mrf.mxu0 }
 0x11f   :  { %v503_v8 = vmax.f32 %v378_v4, 0.0  ;;  %v556_v12 = vpack.c.bf16 %v502_v5, %v500_v9  ;;  %v382_v16 = vadd.f32 %v381_v6, %v1662_v45 }
 0x120   :  { %v383_v10 = vpop.f32.mrf.mxu0 }
 0x121   :  { %v557_v11 = vpack.c.bf16 %v503_v8, %v501_v7  ;;  %v384_v14 = vadd.f32 %v383_v10, %v1660_v44  ;;  %v504_v23 = vmax.f32 %v382_v16, 0.0 }
 0x122   :  { %v385_v13 = vpop.f32.mrf.mxu0 }
 0x123   :  { %v386_v15 = vadd.f32 %v385_v13, %v1662_v45  ;;  %821 = vmatprep.mubr.bf16.mxu1 %v557_v11  ;;  %v505_v21 = vmax.f32 %v384_v14, 0.0 }
 0x124   :  { %v387_v17 = vpop.f32.mrf.mxu0  ;;  %822 = vmatmul.mubr.bf16.gmra.mxu1 %v556_v12 }
 0x125   :  { %v388_v18 = vadd.f32 %v387_v17, %v1660_v44  ;;  %v506_v19 = vmax.f32 %v386_v15, 0.0 }
 0x126   :  { %v391_v20 = vpop.f32.mrf.mxu0 }
 0x127   :  { %v507_v22 = vmax.f32 %v388_v18, 0.0  ;;  %v558_v26 = vpack.c.bf16 %v506_v19, %v504_v23  ;;  %v392_v30 = vadd.f32 %v391_v20, %v1662_v45 }
 0x128   :  { %v393_v24 = vpop.f32.mrf.mxu0 }
 0x129   :  { %v559_v25 = vpack.c.bf16 %v507_v22, %v505_v21  ;;  %v394_v28 = vadd.f32 %v393_v24, %v1660_v44  ;;  %v508_v37 = vmax.f32 %v392_v30, 0.0 }
 0x12a   :  { %v395_v27 = vpop.f32.mrf.mxu0 }
 0x12b   :  { %v396_v29 = vadd.f32 %v395_v27, %v1662_v45  ;;  %829 = vmatprep.mubr.bf16.mxu1 %v559_v25  ;;  %v509_v35 = vmax.f32 %v394_v28, 0.0 }
 0x12c   :  { %v397_v31 = vpop.f32.mrf.mxu0  ;;  %830 = vmatmul.mubr.bf16.gmra.mxu1 %v558_v26 }
 0x12d   :  { %v398_v32 = vadd.f32 %v397_v31, %v1660_v44  ;;  %v510_v33 = vmax.f32 %v396_v29, 0.0 }
 0x12e   :  { %v401_v34 = vpop.f32.mrf.mxu0 }
 0x12f   :  { %v511_v36 = vmax.f32 %v398_v32, 0.0  ;;  %v560_v40 = vpack.c.bf16 %v510_v33, %v508_v37  ;;  %v402_v46 = vadd.f32 %v401_v34, %v1662_v45 }
 0x130   :  { %v403_v38 = vpop.f32.mrf.mxu0 }
 0x131   :  { %v561_v39 = vpack.c.bf16 %v511_v36, %v509_v35  ;;  %v404_v42 = vadd.f32 %v403_v38, %v1660_v44  ;;  %v512_v53 = vmax.f32 %v402_v46, 0.0 }
 0x132   :  { %v405_v41 = vpop.f32.mrf.mxu0 }
 0x133   :  { %v406_v43 = vadd.f32 %v405_v41, %v1662_v45  ;;  %837 = vmatprep.mubr.bf16.mxu1 %v561_v39  ;;  %v513_v51 = vmax.f32 %v404_v42, 0.0 }
 0x134   :  { %v407_v47 = vpop.f32.mrf.mxu0  ;;  %838 = vmatmul.mubr.bf16.gmra.mxu1 %v560_v40 }
 0x135   :  { %v408_v48 = vadd.f32 %v407_v47, %v1660_v44  ;;  %v514_v49 = vmax.f32 %v406_v43, 0.0 }
 0x136   :  { %v411_v50 = vpop.f32.mrf.mxu0 }
 0x137   :  { %v515_v52 = vmax.f32 %v408_v48, 0.0  ;;  %v562_v56 = vpack.c.bf16 %v514_v49, %v512_v53  ;;  %v412_v60 = vadd.f32 %v411_v50, %v1662_v45 }
 0x138   :  { %v413_v54 = vpop.f32.mrf.mxu0 }
 0x139   :  { %v563_v55 = vpack.c.bf16 %v515_v52, %v513_v51  ;;  %v414_v58 = vadd.f32 %v413_v54, %v1660_v44  ;;  %v516_v3 = vmax.f32 %v412_v60, 0.0 }
 0x13a   :  { %v415_v57 = vpop.f32.mrf.mxu0 }
 0x13b   :  { %v416_v59 = vadd.f32 %v415_v57, %v1662_v45  ;;  %845 = vmatprep.mubr.bf16.mxu1 %v563_v55  ;;  %v517_v1 = vmax.f32 %v414_v58, 0.0 }
 0x13c   :  { %v417_v61 = vpop.f32.mrf.mxu0  ;;  %846 = vmatmul.mubr.bf16.gmra.mxu1 %v562_v56 }
 0x13d   :  { %v418_v62 = vadd.f32 %v417_v61, %v1660_v44  ;;  %v518_v63 = vmax.f32 %v416_v59, 0.0 }
 0x13e   :  { %v421_v0 = vpop.f32.mrf.mxu0 }
 0x13f   :  { %v519_v2 = vmax.f32 %v418_v62, 0.0  ;;  %v564_v6 = vpack.c.bf16 %v518_v63, %v516_v3  ;;  %v422_v10 = vadd.f32 %v421_v0, %v1662_v45  ;;  %v1743_v0 = vld [vmem:[%s1790_s4] ss:$0 sm:$0xff]  ;;  %s1443_s4 = smov [#allocation2]  }
 0x140   :  { %v423_v4 = vpop.f32.mrf.mxu0  ;;  %s1089_s15 = sshll.u32 %s1443_s4, 4  ;;  %s1090_s15 = int_to_ptr.vmem [resolvable:$true] %s1089_s15 }
 0x141   :  { %v565_v5 = vpack.c.bf16 %v519_v2, %v517_v1  ;;  %v424_v8 = vadd.f32 %v423_v4, %v1660_v44  ;;  %v520_v17 = vmax.f32 %v422_v10, 0.0  ;;  %s1420_s16 = scalar_lea.vmem %s1090_s15, 2432  ;;  %p1425_p1 = scmp.lt.s32.totalorder %s1090_s15, %s1090_s15 }
 0x142   :  { %v425_v7 = vpop.f32.mrf.mxu0  ;;  %p1421_p0 = scmp.ne.s32.totalorder %s1090_s15, %s1420_s16  ;;  %p1426_p2 = scmp.lt.s32.totalorder %s1420_s16, %s1420_s16 }
 0x143   :  { %v426_v9 = vadd.f32 %v425_v7, %v1662_v45  ;;  %853 = vmatprep.mubr.bf16.mxu1 %v565_v5  ;;  %v521_v15 = vmax.f32 %v424_v8, 0.0 }
 0x144   :  { %v427_v11 = vpop.f32.mrf.mxu0  ;;  %854 = vmatmul.mubr.bf16.gmra.mxu1 %v564_v6  ;;  %p1427_p3 = por %p1426_p2, %p1425_p1 }
 0x145   :  { %v428_v12 = vadd.f32 %v427_v11, %v1660_v44  ;;  %v522_v13 = vmax.f32 %v426_v9, 0.0 }
 0x146   :  { %v431_v14 = vpop.f32.mrf.mxu0  ;;  %p1428_p4 = pnand %p1427_p3, %p1421_p0 }
 0x147   :  { %v523_v16 = vmax.f32 %v428_v12, 0.0  ;;  %v566_v20 = vpack.c.bf16 %v522_v13, %v520_v17  ;;  %v432_v24 = vadd.f32 %v431_v14, %v1662_v45 }
 0x148   :  { %v433_v18 = vpop.f32.mrf.mxu0 }
 0x149   :  { %v567_v19 = vpack.c.bf16 %v523_v16, %v521_v15  ;;  %v434_v22 = vadd.f32 %v433_v18, %v1660_v44  ;;  %v524_v31 = vmax.f32 %v432_v24, 0.0 }
 0x14a   :  { %v435_v21 = vpop.f32.mrf.mxu0 }
 0x14b   :  { %v436_v23 = vadd.f32 %v435_v21, %v1662_v45  ;;  %861 = vmatprep.mubr.bf16.mxu1 %v567_v19  ;;  %v525_v29 = vmax.f32 %v434_v22, 0.0 }
 0x14c   :  { %v437_v25 = vpop.f32.mrf.mxu0  ;;  %862 = vmatmul.mubr.bf16.gmra.mxu1 %v566_v20 }
 0x14d   :  { %v438_v26 = vadd.f32 %v437_v25, %v1660_v44  ;;  %v526_v27 = vmax.f32 %v436_v23, 0.0 }
 0x14e   :  { %v441_v28 = vpop.f32.mrf.mxu0 }
 0x14f   :  { %v527_v30 = vmax.f32 %v438_v26, 0.0  ;;  %v568_v34 = vpack.c.bf16 %v526_v27, %v524_v31  ;;  %v442_v38 = vadd.f32 %v441_v28, %v1662_v45 }
 0x150   :  { %v443_v32 = vpop.f32.mrf.mxu0 }
 0x151   :  { %v569_v33 = vpack.c.bf16 %v527_v30, %v525_v29  ;;  %v444_v36 = vadd.f32 %v443_v32, %v1660_v44  ;;  %v528_v47 = vmax.f32 %v442_v38, 0.0 }
 0x152   :  { %v445_v35 = vpop.f32.mrf.mxu0 }
 0x153   :  { %v446_v37 = vadd.f32 %v445_v35, %v1662_v45  ;;  %869 = vmatprep.mubr.bf16.mxu1 %v569_v33  ;;  %v529_v43 = vmax.f32 %v444_v36, 0.0 }
 0x154   :  { %v447_v39 = vpop.f32.mrf.mxu0  ;;  %870 = vmatmul.mubr.bf16.gmra.mxu1 %v568_v34 }
 0x155   :  { %v448_v40 = vadd.f32 %v447_v39, %v1660_v44  ;;  %v530_v41 = vmax.f32 %v446_v37, 0.0 }
 0x156   :  { %v451_v42 = vpop.f32.mrf.mxu0 }
 0x157   :  { %v531_v46 = vmax.f32 %v448_v40, 0.0  ;;  %v570_v50 = vpack.c.bf16 %v530_v41, %v528_v47  ;;  %v452_v54 = vadd.f32 %v451_v42, %v1662_v45 }
 0x158   :  { %v453_v48 = vpop.f32.mrf.mxu0 }
 0x159   :  { %v571_v49 = vpack.c.bf16 %v531_v46, %v529_v43  ;;  %v454_v52 = vadd.f32 %v453_v48, %v1660_v44  ;;  %v532_v60 = vmax.f32 %v452_v54, 0.0 }
 0x15a   :  { %v455_v51 = vpop.f32.mrf.mxu0 }
 0x15b   :  { %v456_v53 = vadd.f32 %v455_v51, %v1662_v45  ;;  %877 = vmatprep.mubr.bf16.mxu1 %v571_v49  ;;  %v533_v58 = vmax.f32 %v454_v52, 0.0 }
 0x15c   :  { %v457_v55 = vpop.f32.mrf.mxu0  ;;  %878 = vmatmul.mubr.bf16.gmra.mxu1 %v570_v50 }
 0x15d   :  { %v458_v56 = vadd.f32 %v457_v55, %v1660_v44  ;;  %v534_v57 = vmax.f32 %v456_v53, 0.0 }
 0x15f   :  { %v535_v59 = vmax.f32 %v458_v56, 0.0  ;;  %v572_v62 = vpack.c.bf16 %v534_v57, %v532_v60 }
 0x161   :  { %v573_v61 = vpack.c.bf16 %v535_v59, %v533_v58 }
 0x163   :  { %885 = vmatprep.mubr.bf16.mxu1 %v573_v61 }
 0x164   :  { %886 = vmatmul.mubr.bf16.gmra.mxu1 %v572_v62 }
 0x194   :  { %v743_v63 = vpop.f32.mrf.mxu0 }
 0x195   :  { %v744_v2 = vadd.f32 %v1743_v0, %v743_v63 }
 0x196   :  { %v745_v1 = vpop.f32.mrf.mxu0 }
 0x198   :  { %v746_v45 = vpop.f32.mrf.mxu0 }
 0x199   :  { %v747_v44 = vadd.f32 %v1743_v0, %v746_v45 }
 0x19a   :  { %v748_v3 = vpop.f32.mrf.mxu0 }
 0x19b   :  { %v1236_v4 = vpack.c.bf16 %v747_v44, %v744_v2 }
 0x19c   :  { %v751_v5 = vpop.f32.mrf.mxu0 }
 0x19d   :  { %1237 = vst [vmem:[#allocation2] sm:$0xff] %v1236_v4   ;;  %v752_v8 = vadd.f32 %v1743_v0, %v751_v5 }
 0x19e   :  { %v753_v6 = vpop.f32.mrf.mxu0 }
 0x1a0   :  { %v754_v7 = vpop.f32.mrf.mxu0 }
 0x1a1   :  { %v755_v9 = vadd.f32 %v1743_v0, %v754_v7 }
 0x1a2   :  { %v756_v10 = vpop.f32.mrf.mxu0 }
 0x1a3   :  { %v1241_v11 = vpack.c.bf16 %v755_v9, %v752_v8 }
 0x1a4   :  { %v759_v12 = vpop.f32.mrf.mxu0 }
 0x1a5   :  { %1328 = vst [vmem:[#allocation2 + $0x8] sm:$0xff] %v1241_v11   ;;  %v760_v15 = vadd.f32 %v1743_v0, %v759_v12 }
 0x1a6   :  { %v761_v13 = vpop.f32.mrf.mxu0 }
 0x1a8   :  { %v762_v14 = vpop.f32.mrf.mxu0 }
 0x1a9   :  { %v763_v16 = vadd.f32 %v1743_v0, %v762_v14 }
 0x1aa   :  { %v764_v17 = vpop.f32.mrf.mxu0 }
 0x1ab   :  { %v1246_v18 = vpack.c.bf16 %v763_v16, %v760_v15 }
 0x1ac   :  { %v767_v19 = vpop.f32.mrf.mxu1 }
 0x1ad   :  { %1329 = vst [vmem:[#allocation2 + $0x10] sm:$0xff] %v1246_v18   ;;  %v768_v22 = vadd.f32 %v1743_v0, %v767_v19 }
 0x1ae   :  { %v769_v20 = vpop.f32.mrf.mxu1 }
 0x1b0   :  { %v770_v21 = vpop.f32.mrf.mxu1 }
 0x1b1   :  { %v771_v23 = vadd.f32 %v1743_v0, %v770_v21 }
 0x1b2   :  { %v772_v24 = vpop.f32.mrf.mxu1 }
 0x1b3   :  { %v1251_v25 = vpack.c.bf16 %v771_v23, %v768_v22 }
 0x1b4   :  { %v775_v26 = vpop.f32.mrf.mxu1 }
 0x1b5   :  { %1330 = vst [vmem:[#allocation2 + $0x18] sm:$0xff] %v1251_v25   ;;  %v776_v29 = vadd.f32 %v1743_v0, %v775_v26 }
 0x1b6   :  { %v777_v27 = vpop.f32.mrf.mxu1 }
 0x1b8   :  { %v778_v28 = vpop.f32.mrf.mxu1 }
 0x1b9   :  { %v779_v30 = vadd.f32 %v1743_v0, %v778_v28 }
 0x1ba   :  { %v780_v31 = vpop.f32.mrf.mxu1 }
 0x1bb   :  { %v1256_v32 = vpack.c.bf16 %v779_v30, %v776_v29 }
 0x1bc   :  { %v783_v33 = vpop.f32.mrf.mxu1 }
 0x1bd   :  { %1331 = vst [vmem:[#allocation2 + $0x20] sm:$0xff] %v1256_v32   ;;  %v784_v36 = vadd.f32 %v1743_v0, %v783_v33 }
 0x1be   :  { %v785_v34 = vpop.f32.mrf.mxu1 }
 0x1c0   :  { %v786_v35 = vpop.f32.mrf.mxu1 }
 0x1c1   :  { %v787_v37 = vadd.f32 %v1743_v0, %v786_v35 }
 0x1c2   :  { %v788_v38 = vpop.f32.mrf.mxu1 }
 0x1c3   :  { %v1261_v39 = vpack.c.bf16 %v787_v37, %v784_v36 }
 0x1c4   :  { %v791_v40 = vpop.f32.mrf.mxu1 }
 0x1c5   :  { %1332 = vst [vmem:[#allocation2 + $0x28] sm:$0xff] %v1261_v39   ;;  %v792_v43 = vadd.f32 %v1743_v0, %v791_v40 }
 0x1c6   :  { %v793_v41 = vpop.f32.mrf.mxu1 }
 0x1c8   :  { %v794_v42 = vpop.f32.mrf.mxu1 }
 0x1c9   :  { %v795_v46 = vadd.f32 %v1743_v0, %v794_v42 }
 0x1ca   :  { %v796_v47 = vpop.f32.mrf.mxu1 }
 0x1cb   :  { %v1266_v48 = vpack.c.bf16 %v795_v46, %v792_v43 }
 0x1cc   :  { %v799_v49 = vpop.f32.mrf.mxu1 }
 0x1cd   :  { %1333 = vst [vmem:[#allocation2 + $0x30] sm:$0xff] %v1266_v48   ;;  %v800_v52 = vadd.f32 %v1743_v0, %v799_v49 }
 0x1ce   :  { %v801_v50 = vpop.f32.mrf.mxu1 }
 0x1d0   :  { %v802_v51 = vpop.f32.mrf.mxu1 }
 0x1d1   :  { %v803_v53 = vadd.f32 %v1743_v0, %v802_v51 }
 0x1d2   :  { %v804_v54 = vpop.f32.mrf.mxu1 }
 0x1d3   :  { %v1271_v55 = vpack.c.bf16 %v803_v53, %v800_v52 }
 0x1d4   :  { %v807_v56 = vpop.f32.mrf.mxu1 }
 0x1d5   :  { %1334 = vst [vmem:[#allocation2 + $0x38] sm:$0xff] %v1271_v55   ;;  %v808_v59 = vadd.f32 %v1743_v0, %v807_v56 }
 0x1d6   :  { %v809_v57 = vpop.f32.mrf.mxu1 }
 0x1d8   :  { %v810_v58 = vpop.f32.mrf.mxu1 }
 0x1d9   :  { %v811_v60 = vadd.f32 %v1743_v0, %v810_v58 }
 0x1da   :  { %v812_v61 = vpop.f32.mrf.mxu1 }
 0x1db   :  { %v1276_v62 = vpack.c.bf16 %v811_v60, %v808_v59 }
 0x1dc   :  { %v815_v63 = vpop.f32.mrf.mxu1 }
 0x1dd   :  { %1335 = vst [vmem:[#allocation2 + $0x40] sm:$0xff] %v1276_v62   ;;  %v816_v2 = vadd.f32 %v1743_v0, %v815_v63 }
 0x1de   :  { %v817_v1 = vpop.f32.mrf.mxu1 }
 0x1e0   :  { %v818_v45 = vpop.f32.mrf.mxu1 }
 0x1e1   :  { %v819_v44 = vadd.f32 %v1743_v0, %v818_v45 }
 0x1e2   :  { %v820_v3 = vpop.f32.mrf.mxu1 }
 0x1e3   :  { %v1281_v4 = vpack.c.bf16 %v819_v44, %v816_v2 }
 0x1e4   :  { %v823_v5 = vpop.f32.mrf.mxu1 }
 0x1e5   :  { %1336 = vst [vmem:[#allocation2 + $0x48] sm:$0xff] %v1281_v4   ;;  %v824_v8 = vadd.f32 %v1743_v0, %v823_v5 }
 0x1e6   :  { %v825_v6 = vpop.f32.mrf.mxu1 }
 0x1e8   :  { %v826_v7 = vpop.f32.mrf.mxu1 }
 0x1e9   :  { %v827_v9 = vadd.f32 %v1743_v0, %v826_v7 }
 0x1ea   :  { %v828_v10 = vpop.f32.mrf.mxu1 }
 0x1eb   :  { %v1286_v11 = vpack.c.bf16 %v827_v9, %v824_v8 }
 0x1ec   :  { %v831_v12 = vpop.f32.mrf.mxu1 }
 0x1ed   :  { %1337 = vst [vmem:[#allocation2 + $0x50] sm:$0xff] %v1286_v11   ;;  %v832_v15 = vadd.f32 %v1743_v0, %v831_v12 }
 0x1ee   :  { %v833_v13 = vpop.f32.mrf.mxu1 }
 0x1f0   :  { %v834_v14 = vpop.f32.mrf.mxu1 }
 0x1f1   :  { %v835_v16 = vadd.f32 %v1743_v0, %v834_v14 }
 0x1f2   :  { %v836_v17 = vpop.f32.mrf.mxu1 }
 0x1f3   :  { %v1291_v18 = vpack.c.bf16 %v835_v16, %v832_v15 }
 0x1f4   :  { %v839_v19 = vpop.f32.mrf.mxu1 }
 0x1f5   :  { %1338 = vst [vmem:[#allocation2 + $0x58] sm:$0xff] %v1291_v18   ;;  %v840_v22 = vadd.f32 %v1743_v0, %v839_v19 }
 0x1f6   :  { %v841_v20 = vpop.f32.mrf.mxu1 }
 0x1f8   :  { %v842_v21 = vpop.f32.mrf.mxu1 }
 0x1f9   :  { %v843_v23 = vadd.f32 %v1743_v0, %v842_v21 }
 0x1fa   :  { %v844_v24 = vpop.f32.mrf.mxu1 }
 0x1fb   :  { %v1296_v25 = vpack.c.bf16 %v843_v23, %v840_v22 }
 0x1fc   :  { %v847_v26 = vpop.f32.mrf.mxu1 }
 0x1fd   :  { %1339 = vst [vmem:[#allocation2 + $0x60] sm:$0xff] %v1296_v25   ;;  %v848_v29 = vadd.f32 %v1743_v0, %v847_v26 }
 0x1fe   :  { %v849_v27 = vpop.f32.mrf.mxu1 }
 0x200   :  { %v850_v28 = vpop.f32.mrf.mxu1 }
 0x201   :  { %v851_v30 = vadd.f32 %v1743_v0, %v850_v28 }
 0x202   :  { %v852_v31 = vpop.f32.mrf.mxu1 }
 0x203   :  { %v1301_v32 = vpack.c.bf16 %v851_v30, %v848_v29 }
 0x204   :  { %v855_v33 = vpop.f32.mrf.mxu1 }
 0x205   :  { %1340 = vst [vmem:[#allocation2 + $0x68] sm:$0xff] %v1301_v32   ;;  %v856_v36 = vadd.f32 %v1743_v0, %v855_v33 }
 0x206   :  { %v857_v34 = vpop.f32.mrf.mxu1 }
 0x208   :  { %v858_v35 = vpop.f32.mrf.mxu1 }
 0x209   :  { %v859_v37 = vadd.f32 %v1743_v0, %v858_v35 }
 0x20a   :  { %v860_v38 = vpop.f32.mrf.mxu1 }
 0x20b   :  { %v1306_v39 = vpack.c.bf16 %v859_v37, %v856_v36 }
 0x20c   :  { %v863_v40 = vpop.f32.mrf.mxu1 }
 0x20d   :  { %1341 = vst [vmem:[#allocation2 + $0x70] sm:$0xff] %v1306_v39   ;;  %v864_v43 = vadd.f32 %v1743_v0, %v863_v40 }
 0x20e   :  { %v865_v41 = vpop.f32.mrf.mxu1 }
 0x210   :  { %v866_v42 = vpop.f32.mrf.mxu1 }
 0x211   :  { %v867_v46 = vadd.f32 %v1743_v0, %v866_v42 }
 0x212   :  { %v868_v47 = vpop.f32.mrf.mxu1 }
 0x213   :  { %v1311_v48 = vpack.c.bf16 %v867_v46, %v864_v43 }
 0x214   :  { %v871_v49 = vpop.f32.mrf.mxu1 }
 0x215   :  { %1342 = vst [vmem:[#allocation2 + $0x78] sm:$0xff] %v1311_v48   ;;  %v872_v52 = vadd.f32 %v1743_v0, %v871_v49 }
 0x216   :  { %v873_v50 = vpop.f32.mrf.mxu1 }
 0x218   :  { %v874_v51 = vpop.f32.mrf.mxu1 }
 0x219   :  { %v875_v53 = vadd.f32 %v1743_v0, %v874_v51 }
 0x21a   :  { %v876_v54 = vpop.f32.mrf.mxu1 }
 0x21b   :  { %v1316_v55 = vpack.c.bf16 %v875_v53, %v872_v52 }
 0x21c   :  { %v879_v56 = vpop.f32.mrf.mxu1 }
 0x21d   :  { %1343 = vst [vmem:[#allocation2 + $0x80] sm:$0xff] %v1316_v55   ;;  %v880_v59 = vadd.f32 %v1743_v0, %v879_v56 }
 0x21e   :  { %v881_v57 = vpop.f32.mrf.mxu1 }
 0x220   :  { %v882_v58 = vpop.f32.mrf.mxu1 }
 0x221   :  { %v883_v60 = vadd.f32 %v1743_v0, %v882_v58 }
 0x222   :  { %v884_v61 = vpop.f32.mrf.mxu1 }
 0x223   :  { %v1321_v62 = vpack.c.bf16 %v883_v60, %v880_v59 }
 0x224   :  { %v887_v63 = vpop.f32.mrf.mxu1 }
 0x225   :  { %1344 = vst [vmem:[#allocation2 + $0x88] sm:$0xff] %v1321_v62   ;;  %v888_v2 = vadd.f32 %v1743_v0, %v887_v63 }
 0x226   :  { %v889_v1 = vpop.f32.mrf.mxu1 }
 0x228   :  { %v890_v45 = vpop.f32.mrf.mxu1 }
 0x229   :  { %v891_v44 = vadd.f32 %v1743_v0, %v890_v45 }
 0x22a   :  { %v892_v3 = vpop.f32.mrf.mxu1 }
 0x22b   :  { %v1326_v4 = vpack.c.bf16 %v891_v44, %v888_v2 }
 0x22d   :  { %1345 = vst [vmem:[#allocation2 + $0x90] sm:$0xff] %v1326_v4  }
 0x22e   :  { %1431 = shalt.err (!%p1428_p4)
}
 0x22f   :  { %s1444_s17 = smov 64   ;;  %s1445_s18 = smov 4  }
 0x230   :  { %1095 = dma.vmem_to_hbm [thread:$0]  %s1090_s15, 2432, %s1791_s5, [#allocation3], %s1444_s17, %s1444_s17, %s1445_s18  }
 0x231   :  { %1440 = dma.done.wait [#allocation3], 2432  }
 0x232   :  { %1441 = vsyncadd [#allocation3], 4294964864 }
 0x233   :  { %1099 = vsyncpa [#allocation3], 1 }

</bundles_post_ra>
